<compile_context>
chip_gen: v7x
topology: tpu7x:2x2x1
jax: 0.10.0
libtpu: 0.0.40
codegen_flags: <defaults>
</compile_context>

<pallas_src>
import functools

import jax
import jax.numpy as jnp
from jax.experimental import pallas as pl
from jax.experimental.pallas import tpu as pltpu

_LANE = 128
_SUBLANE = 8


def _round_up(x, m):
    return ((x + m - 1) // m) * m


def _actor_kernel(meta, state_ref, slab_ref, out_ref):
    n_musc = meta["n_musc"]
    sd = meta["state_dim"]
    L = meta["L"]
    r_w1, r_b1, r_w2, r_b2, r_wh, r_bh = meta["offs"]

    x = state_ref[...]

    # Trunk: h = relu(l2(relu(l1(state)))) -- shared by muscle & motor heads.
    w1 = slab_ref[r_w1:r_w1 + sd, :]
    b1 = slab_ref[r_b1:r_b1 + 1, :]
    h = jnp.dot(x, w1, preferred_element_type=jnp.float32) + b1
    h = jnp.maximum(h, 0.0)

    w2 = slab_ref[r_w2:r_w2 + L, :]
    b2 = slab_ref[r_b2:r_b2 + 1, :]
    h = jnp.dot(h, w2, preferred_element_type=jnp.float32) + b2
    h = jnp.maximum(h, 0.0)

    # Single fused head matmul: heads concatenated along the lane axis as
    # [mu_muscles | sigma_muscles | mu_motors | sigma_motors | zero-pad].
    wh = slab_ref[r_wh:r_wh + L, :]
    bh = slab_ref[r_bh:r_bh + 1, :]
    y = jnp.dot(h, wh, preferred_element_type=jnp.float32) + bh

    # Per-head activations, full 128-lane dense, sharing one exp().
    col = jax.lax.broadcasted_iota(jnp.int32, y.shape, dimension=1)
    e = jnp.exp(jnp.minimum(y, 20.0))
    sig = e * pl.reciprocal(1.0 + e, approx=False)     # sigmoid(y)
    sp = jnp.where(y > 20.0, y, jnp.log1p(e))          # softplus(y)
    rl = jnp.maximum(y, 0.0)                           # relu(y)
    motor_mu = (col >= 2 * n_musc) & (col < 2 * n_musc + 4)
    out = jnp.where(col < n_musc, sig, jnp.where(motor_mu, rl, sp))
    out_ref[...] = out.astype(out_ref.dtype)


def pack_params(p):
    """Build one tile-aligned f32 slab holding trunk + fused-head params."""
    state_dim, net_width = p["w1"].shape
    n_musc = p["wmm"].shape[1]
    L = max(_round_up(net_width, _LANE), _round_up(2 * n_musc + 8, _LANE))
    Sr = _round_up(state_dim, _SUBLANE)

    def pad_to(a, rows, cols):
        return jnp.pad(a, ((0, rows - a.shape[0]), (0, cols - a.shape[1])))

    # Fuse the four heads along the lane axis (one matmul in the kernel).
    wh = jnp.concatenate([p["wmm"], p["wsm"], p["wmo"], p["wso"]], axis=1)
    bh = jnp.concatenate([p["bmm"], p["bsm"], p["bmo"], p["bso"]], axis=1)

    chunks = [
        pad_to(p["w1"], Sr, L),        # rows [0, Sr)
        pad_to(p["b1"], _SUBLANE, L),  # bias in first row of its chunk
        pad_to(p["w2"], L, L),         # contraction padded to L (h is L lanes)
        pad_to(p["b2"], _SUBLANE, L),
        pad_to(wh, L, L),
        pad_to(bh, _SUBLANE, L),
    ]
    slab = jnp.concatenate(chunks, axis=0).astype(jnp.float32)

    r_w1 = 0
    r_b1 = Sr
    r_w2 = r_b1 + _SUBLANE
    r_b2 = r_w2 + L
    r_wh = r_b2 + _SUBLANE
    r_bh = r_wh + L
    meta = dict(n_musc=n_musc, state_dim=state_dim, L=L,
                offs=(r_w1, r_b1, r_w2, r_b2, r_wh, r_bh))
    return {"slab": slab, "meta": meta}


def gaussian_actor_forward(state, packed):
    """state: [B, state_dim] float32.  packed: output of pack_params."""
    slab, meta = packed["slab"], packed["meta"]
    B = state.shape[0]
    n_musc, L = meta["n_musc"], meta["L"]

    vmem = pl.BlockSpec(memory_space=pltpu.MemorySpace.VMEM)
    out = pl.pallas_call(
        functools.partial(_actor_kernel, meta),
        out_shape=jax.ShapeDtypeStruct((B, L), jnp.float32),
        in_specs=[vmem, vmem],
        out_specs=vmem,
    )(state.astype(jnp.float32), slab)

    # Single slice of the lane-packed output, then split the small array.
    head = out[:, : 2 * n_musc + 8]
    mu_musc = head[:, :n_musc]
    sig_musc = head[:, n_musc:2 * n_musc]
    mu_mot = head[:, 2 * n_musc:2 * n_musc + 4]
    sig_mot = head[:, 2 * n_musc + 4:2 * n_musc + 8]
    return mu_musc, sig_musc, mu_mot, sig_mot


def init_params(key, state_dim, action_dim, net_width):
    """Deterministic synthetic parameters (PyTorch Linear shapes, transposed)."""
    ks = jax.random.split(key, 12)

    def lin(kw, kb, fan_in, fan_out):
        bound = 1.0 / jnp.sqrt(fan_in)
        w = jax.random.uniform(kw, (fan_in, fan_out), jnp.float32, -bound, bound)
        b = jax.random.uniform(kb, (1, fan_out), jnp.float32, -bound, bound)
        return w, b

    n_musc = action_dim - 4
    p = {}
    p["w1"], p["b1"] = lin(ks[0], ks[1], state_dim, net_width)
    p["w2"], p["b2"] = lin(ks[2], ks[3], net_width, net_width)
    p["wmm"], p["bmm"] = lin(ks[4], ks[5], net_width, n_musc)
    p["wsm"], p["bsm"] = lin(ks[6], ks[7], net_width, n_musc)
    p["wmo"], p["bmo"] = lin(ks[8], ks[9], net_width, 4)
    p["wso"], p["bso"] = lin(ks[10], ks[11], net_width, 4)
    return p


if __name__ == "__main__":
    # Small, module-consistent shapes.
    B = 8
    state_dim = 32
    net_width = 64
    action_dim = 12  # -> 8 muscle actions + 4 motor actions

    key = jax.random.PRNGKey(0)
    k_params, k_state = jax.random.split(key)

    params = init_params(k_params, state_dim, action_dim, net_width)
    state = jax.random.normal(k_state, (B, state_dim), dtype=jnp.float32)

    packed = pack_params(params)
    mu_musc, sig_musc, mu_mot, sig_mot = gaussian_actor_forward(state, packed)
    jax.block_until_ready((mu_musc, sig_musc, mu_mot, sig_mot))

    # Pure-JAX reference (unfused / unpadded weights).
    def ref(x, p):
        h = jax.nn.relu(x @ p["w1"] + p["b1"])
        h = jax.nn.relu(h @ p["w2"] + p["b2"])
        return (
            jax.nn.sigmoid(h @ p["wmm"] + p["bmm"]),
            jax.nn.softplus(h @ p["wsm"] + p["bsm"]),
            jax.nn.relu(h @ p["wmo"] + p["bmo"]),
            jax.nn.softplus(h @ p["wso"] + p["bso"]),
        )

    r_mu_musc, r_sig_musc, r_mu_mot, r_sig_mot = ref(state, params)
    n_musc = action_dim - 4
    assert mu_musc.shape == (B, n_musc) and mu_mot.shape == (B, 4)
    assert jnp.allclose(mu_musc, r_mu_musc, atol=1e-5)
    assert jnp.allclose(sig_musc, r_sig_musc, atol=1e-5)
    assert jnp.allclose(mu_mot, r_mu_mot, atol=1e-5)
    assert jnp.allclose(sig_mot, r_sig_mot, atol=1e-5)

    print("KERNEL_OK")
</pallas_src>

<mosaic_0001>
module attributes {stable_mosaic.version = 11 : i64} {
  func.func @_actor_kernel(%arg0: memref<8x32xf32, #tpu.memory_space<vmem>>, %arg1: memref<312x128xf32, #tpu.memory_space<vmem>>, %arg2: memref<8x128xf32, #tpu.memory_space<vmem>>) attributes {dimension_semantics = [], scalar_prefetch = 0 : i64, scratch_operands = 0 : i64, tpu.core_type = #tpu.core_type<tc>} {
    %c0 = arith.constant 0 : index
    %c0_0 = arith.constant 0 : index
    %0 = vector.load %arg0[%c0, %c0_0] : memref<8x32xf32, #tpu.memory_space<vmem>>, vector<8x32xf32>
    %c0_1 = arith.constant 0 : index
    %c0_2 = arith.constant 0 : index
    %1 = vector.load %arg1[%c0_1, %c0_2] : memref<312x128xf32, #tpu.memory_space<vmem>>, vector<32x128xf32>
    %c32 = arith.constant 32 : index
    %c0_3 = arith.constant 0 : index
    %2 = vector.load %arg1[%c32, %c0_3] : memref<312x128xf32, #tpu.memory_space<vmem>>, vector<1x128xf32>
    %cst = arith.constant dense<0.000000e+00> : vector<8x128xf32>
    %3 = tpu.matmul %0, %1, %cst {dimension_numbers = #tpu.dot_dimension_numbers<[1], [0], [0], [1], [0, 0, 1, 1], [], []>} : vector<8x32xf32>, vector<32x128xf32>, vector<8x128xf32> -> vector<8x128xf32>
    %4 = vector.broadcast %2 : vector<1x128xf32> to vector<8x128xf32>
    %5 = arith.addf %3, %4 : vector<8x128xf32>
    %cst_4 = arith.constant 0.000000e+00 : f32
    %6 = vector.broadcast %cst_4 : f32 to vector<8x128xf32>
    %7 = arith.maximumf %5, %6 : vector<8x128xf32>
    %c40 = arith.constant 40 : index
    %c0_5 = arith.constant 0 : index
    %8 = vector.load %arg1[%c40, %c0_5] : memref<312x128xf32, #tpu.memory_space<vmem>>, vector<128x128xf32>
    %c168 = arith.constant 168 : index
    %c0_6 = arith.constant 0 : index
    %9 = vector.load %arg1[%c168, %c0_6] : memref<312x128xf32, #tpu.memory_space<vmem>>, vector<1x128xf32>
    %cst_7 = arith.constant dense<0.000000e+00> : vector<8x128xf32>
    %10 = tpu.matmul %7, %8, %cst_7 {dimension_numbers = #tpu.dot_dimension_numbers<[1], [0], [0], [1], [0, 0, 1, 1], [], []>} : vector<8x128xf32>, vector<128x128xf32>, vector<8x128xf32> -> vector<8x128xf32>
    %11 = vector.broadcast %9 : vector<1x128xf32> to vector<8x128xf32>
    %12 = arith.addf %10, %11 : vector<8x128xf32>
    %cst_8 = arith.constant 0.000000e+00 : f32
    %13 = vector.broadcast %cst_8 : f32 to vector<8x128xf32>
    %14 = arith.maximumf %12, %13 : vector<8x128xf32>
    %c176 = arith.constant 176 : index
    %c0_9 = arith.constant 0 : index
    %15 = vector.load %arg1[%c176, %c0_9] : memref<312x128xf32, #tpu.memory_space<vmem>>, vector<128x128xf32>
    %c304 = arith.constant 304 : index
    %c0_10 = arith.constant 0 : index
    %16 = vector.load %arg1[%c304, %c0_10] : memref<312x128xf32, #tpu.memory_space<vmem>>, vector<1x128xf32>
    %cst_11 = arith.constant dense<0.000000e+00> : vector<8x128xf32>
    %17 = tpu.matmul %14, %15, %cst_11 {dimension_numbers = #tpu.dot_dimension_numbers<[1], [0], [0], [1], [0, 0, 1, 1], [], []>} : vector<8x128xf32>, vector<128x128xf32>, vector<8x128xf32> -> vector<8x128xf32>
    %18 = vector.broadcast %16 : vector<1x128xf32> to vector<8x128xf32>
    %19 = arith.addf %17, %18 : vector<8x128xf32>
    %20 = tpu.iota {dimensions = array<i32: 1>} : vector<8x128xi32>
    %cst_12 = arith.constant 2.000000e+01 : f32
    %21 = vector.broadcast %cst_12 : f32 to vector<8x128xf32>
    %22 = arith.minimumf %19, %21 : vector<8x128xf32>
    %23 = math.exp %22 : vector<8x128xf32>
    %cst_13 = arith.constant 1.000000e+00 : f32
    %24 = vector.broadcast %cst_13 : f32 to vector<8x128xf32>
    %25 = arith.addf %24, %23 : vector<8x128xf32>
    %26 = tpu.reciprocal %25 : vector<8x128xf32> -> vector<8x128xf32>
    %27 = arith.mulf %23, %26 : vector<8x128xf32>
    %cst_14 = arith.constant 2.000000e+01 : f32
    %28 = vector.broadcast %cst_14 : f32 to vector<8x128xf32>
    %29 = arith.cmpf ogt, %19, %28 : vector<8x128xf32>
    %30 = math.log1p %23 : vector<8x128xf32>
    %31 = arith.select %29, %19, %30 : vector<8x128xi1>, vector<8x128xf32>
    %cst_15 = arith.constant 0.000000e+00 : f32
    %32 = vector.broadcast %cst_15 : f32 to vector<8x128xf32>
    %33 = arith.maximumf %19, %32 : vector<8x128xf32>
    %c16_i32 = arith.constant 16 : i32
    %34 = vector.broadcast %c16_i32 : i32 to vector<8x128xi32>
    %35 = arith.cmpi sge, %20, %34 : vector<8x128xi32>
    %c20_i32 = arith.constant 20 : i32
    %36 = vector.broadcast %c20_i32 : i32 to vector<8x128xi32>
    %37 = arith.cmpi slt, %20, %36 : vector<8x128xi32>
    %38 = arith.andi %35, %37 : vector<8x128xi1>
    %c8_i32 = arith.constant 8 : i32
    %39 = vector.broadcast %c8_i32 : i32 to vector<8x128xi32>
    %40 = arith.cmpi slt, %20, %39 : vector<8x128xi32>
    %41 = arith.select %38, %33, %31 : vector<8x128xi1>, vector<8x128xf32>
    %42 = arith.select %40, %27, %41 : vector<8x128xi1>, vector<8x128xf32>
    %c0_16 = arith.constant 0 : index
    %c0_17 = arith.constant 0 : index
    %43 = vector.load %arg2[%c0_16, %c0_17] : memref<8x128xf32, #tpu.memory_space<vmem>>, vector<8x128xf32>
    tpu.vector_store %arg2[%c0_16, %c0_17], %42 {strides = array<i32>} : memref<8x128xf32, #tpu.memory_space<vmem>>, vector<8x128xf32>,
    return
  }
}

</mosaic_0001>

<bundles_post_ra>
// kernel: tpu_custom_call.1
= control target key start
LH: loop header
LB: loop body
LE: loop exit
PB: predicated region body
PF: predicated region fallthrough
CT: control target
= control target key end

     0   :  { %7 = vsyncpa [#allocation3], 0  ;;  %s700_s0 = inlined_call_operand.hbm [shape: f32[8,32], index: 0, kind: input, shape index: {}]   ;;  %s701_s1 = inlined_call_operand.hbm [shape: f32[312,128], index: 1, kind: input, shape index: {}]   ;;  %s702_s2 = inlined_call_operand.hbm [shape: f32[8,128], index: 2, kind: output, shape index: {}]  }
   0x1   :  { %8 = vsyncpa [#allocation6], 0 }
   0x2   :  { %9 = vsyncpa [#allocation4], 0  ;;  %s613_s9 = smov [#allocation2]   ;;  %s614_s11 = smov [#allocation5]  }
   0x3   :  { %s16_s10 = sshll.u32 %s613_s9, 4  ;;  %s25_s12 = sshll.u32 %s614_s11, 4  ;;  %s17_s10 = int_to_ptr.vmem [resolvable:$true] %s16_s10  ;;  %s636_s12 = int_to_ptr.vmem [resolvable:$true] %s25_s12 }
   0x4   :  { %s541_s15 = scalar_lea.hbm %s700_s0, 128 }
   0x5   :  { %p542_p0 = scmp.ne.s32.totalorder %s700_s0, %s541_s15  ;;  %p545_p1 = scmp.lt.u32.totalorder %s541_s15, %s700_s0 }
   0x7   :  { %p547_p2 = pnand %p545_p1, %p542_p0 }
   0x9   :  { %550 = shalt.err (!%p547_p2)
}
   0xa   :  { %s551_s20 = scalar_lea.vmem %s17_s10, 128  ;;  %p556_p4 = scmp.lt.s32.totalorder %s17_s10, %s17_s10 }
   0xb   :  { %p552_p3 = scmp.ne.s32.totalorder %s17_s10, %s551_s20  ;;  %p557_p5 = scmp.lt.s32.totalorder %s551_s20, %s551_s20 }
   0xd   :  { %p558_p6 = por %p557_p5, %p556_p4 }
   0xf   :  { %p559_p7 = pnand %p558_p6, %p552_p3 }
  0x11   :  { %562 = shalt.err (!%p559_p7)
}
  0x12   :  { %19 = dma.hbm_to_vmem [thread:$0]  %s700_s0, 128, %s17_s10, [#allocation3]  }
  0x13   :  { %s563_s25 = scalar_lea.hbm %s701_s1, 4992 }
  0x14   :  { %p564_p8 = scmp.ne.s32.totalorder %s701_s1, %s563_s25  ;;  %p567_p9 = scmp.lt.u32.totalorder %s563_s25, %s701_s1 }
  0x16   :  { %p569_p10 = pnand %p567_p9, %p564_p8 }
  0x18   :  { %572 = shalt.err (!%p569_p10)
}
  0x19   :  { %s573_s30 = scalar_lea.vmem %s636_s12, 4992  ;;  %p578_p12 = scmp.lt.s32.totalorder %s636_s12, %s636_s12 }
  0x1a   :  { %p574_p11 = scmp.ne.s32.totalorder %s636_s12, %s573_s30  ;;  %p579_p13 = scmp.lt.s32.totalorder %s573_s30, %s573_s30 }
  0x1c   :  { %p580_p0 = por %p579_p13, %p578_p12 }
  0x1e   :  { %p581_p1 = pnand %p580_p0, %p574_p11 }
  0x20   :  { %584 = shalt.err (!%p581_p1)
}
  0x21   :  { %s615_s0 = smov 128   ;;  %s616_s3 = smov 8  }
  0x22   :  { %31 = dma.hbm_to_vmem [thread:$0]  %s701_s1, 4992, %s636_s12, [#allocation6], %s615_s0, %s615_s0, %s616_s3  }
  0x23   :  { %607 = dma.done.wait [#allocation3], 128  }
  0x24   :  { %608 = vsyncadd [#allocation3], 4294967168 }
  0x25   :  { %609 = dma.done.wait [#allocation6], 4992  }
  0x26   :  { %610 = vsyncadd [#allocation6], 4294962304  ;;  %v617_v0 = vmov 0.0|0.0   ;;  %vm618_vm0 = vmmov 0   ;;  %v619_v1 = vmov 0.0   ;;  %v39_v2 = vld [vmem:[#allocation5] sm:$0xff] }
  0x27   :  { %473 = vmatprep.subr.bf16.mxu0 %v617_v0  ;;  %400 = vmatprep.mubr.msk.f32.mxu0 %vm618_vm0, %v619_v1  ;;  %v40_v3 = vld [vmem:[#allocation5 + $0x8] sm:$0xff]  ;;  %v41_v4 = vld [vmem:[#allocation5 + $0x10] sm:$0xff]  ;;  %v42_v6 = vld [vmem:[#allocation5 + $0x18] sm:$0xff]  ;;  %vm48_vm1 = vcmask 261120   ;;  %s620_s1 = smov [#allocation7]  }
  0x28   :  { %479 = vmatprep.subr.bf16.mxu1 %v617_v0  ;;  %435 = vmatprep.mubr.msk.f32.mxu1 %vm618_vm0, %v619_v1  ;;  %v474_v5 = vpack.c.bf16 %v40_v3, %v39_v2  ;;  %v123_v7 = vld [vmem:[#allocation5 + $0x28] sm:$0xff]  ;;  %v124_v8 = vld [vmem:[#allocation5 + $0x30] sm:$0xff]  ;;  %v125_v9 = vld [vmem:[#allocation5 + $0x38] sm:$0xff]  ;;  %v477_v11 = vpack.c.bf16 %v42_v6, %v41_v4  ;;  %s339_s6 = sshll.u32 %s620_s1, 4  ;;  %s340_s6 = int_to_ptr.vmem [resolvable:$true] %s339_s6 }
  0x29   :  { %v126_v10 = vld [vmem:[#allocation5 + $0x40] sm:$0xff]  ;;  %v480_v12 = vpack.c.bf16 %v124_v8, %v123_v7  ;;  %v127_v14 = vld [vmem:[#allocation5 + $0x48] sm:$0xff]  ;;  %v128_v15 = vld [vmem:[#allocation5 + $0x50] sm:$0xff]  ;;  %s585_s7 = scalar_lea.vmem %s340_s6, 128  ;;  %p590_p3 = scmp.lt.s32.totalorder %s340_s6, %s340_s6 }
  0x2a   :  { %475 = vmatpush3.bf16.msra.mxu0 %v474_v5  ;;  %v483_v13 = vpack.c.bf16 %v126_v10, %v125_v9  ;;  %v38_v16 = vld [vmem:[#allocation2] sm:$0xff]  ;;  %v486_v17 = vpack.c.bf16 %v128_v15, %v127_v14  ;;  %v130_v19 = vld [vmem:[#allocation5 + $0x60] sm:$0xff]  ;;  %v131_v21 = vld [vmem:[#allocation5 + $0x68] sm:$0xff]  ;;  %p586_p2 = scmp.ne.s32.totalorder %s340_s6, %s585_s7  ;;  %p591_p4 = scmp.lt.s32.totalorder %s585_s7, %s585_s7 }
  0x2b   :  { %476 = vmatprep.subr.bf16.mxu0 %v617_v0  ;;  %481 = vmatpush3.bf16.msra.mxu1 %v480_v12  ;;  %v129_v18 = vld [vmem:[#allocation5 + $0x58] sm:$0xff]  ;;  %v132_v22 = vld [vmem:[#allocation5 + $0x70] sm:$0xff]  ;;  %v134_v25 = vld [vmem:[#allocation5 + $0x80] sm:$0xff] }
  0x2c   :  { %482 = vmatprep.subr.bf16.mxu1 %v617_v0  ;;  %v489_v20 = vpack.c.bf16 %v130_v19, %v129_v18  ;;  %v492_v23 = vpack.c.bf16 %v132_v22, %v131_v21  ;;  %v133_v24 = vld [vmem:[#allocation5 + $0x78] sm:$0xff]  ;;  %v135_v27 = vld [vmem:[#allocation5 + $0x88] sm:$0xff]  ;;  %v136_v28 = vld [vmem:[#allocation5 + $0x90] sm:$0xff]  ;;  %p592_p5 = por %p591_p4, %p590_p3 }
  0x2d   :  { %v495_v26 = vpack.c.bf16 %v134_v25, %v133_v24  ;;  %v498_v29 = vpack.c.bf16 %v136_v28, %v135_v27  ;;  %v137_v30 = vld [vmem:[#allocation5 + $0x98] sm:$0xff]  ;;  %v138_v31 = vld [vmem:[#allocation5 + $0xa0] sm:$0xff]  ;;  %v215_v33 = vld [vmem:[#allocation5 + $0xb0] sm:$0xff] }
  0x2e   :  { %478 = vmatpush3.bf16.msra.mxu0 %v477_v11  ;;  %v501_v32 = vpack.c.bf16 %v138_v31, %v137_v30  ;;  %v216_v34 = vld [vmem:[#allocation5 + $0xb8] sm:$0xff]  ;;  %v217_v35 = vld [vmem:[#allocation5 + $0xc0] sm:$0xff]  ;;  %v218_v37 = vld [vmem:[#allocation5 + $0xc8] sm:$0xff]  ;;  %v306_v11 = vlaneseq  ;;  %p593_p6 = pnand %p592_p5, %p586_p2 }
  0x2f   :  { %503 = vmatprep.subr.bf16.mxu0 %v617_v0  ;;  %484 = vmatpush3.bf16.msra.mxu1 %v483_v13  ;;  %v504_v36 = vpack.c.bf16 %v216_v34, %v215_v33  ;;  %v507_v38 = vpack.c.bf16 %v218_v37, %v217_v35  ;;  %v219_v39 = vld [vmem:[#allocation5 + $0xd0] sm:$0xff]  ;;  %v220_v40 = vld [vmem:[#allocation5 + $0xd8] sm:$0xff]  ;;  %v221_v42 = vld [vmem:[#allocation5 + $0xe0] sm:$0xff] }
  0x30   :  { %485 = vmatprep.subr.bf16.mxu1 %v617_v0  ;;  %v510_v41 = vpack.c.bf16 %v220_v40, %v219_v39  ;;  %v222_v43 = vld [vmem:[#allocation5 + $0xe8] sm:$0xff]  ;;  %v223_v45 = vld [vmem:[#allocation5 + $0xf0] sm:$0xff]  ;;  %v224_v46 = vld [vmem:[#allocation5 + $0xf8] sm:$0xff]  ;;  %v307_v13 = vand.u32 127, %v306_v11 }
  0x31   :  { %401 = vmatmul.mubr.msk.f32.vlgmr.msra.gmra.mrb[0].mxu0 %vm48_vm1, %v38_v16  ;;  %v513_v44 = vpack.c.bf16 %v222_v43, %v221_v42  ;;  %v516_v47 = vpack.c.bf16 %v224_v46, %v223_v45  ;;  %v225_v48 = vld [vmem:[#allocation5 + $0x100] sm:$0xff]  ;;  %v226_v49 = vld [vmem:[#allocation5 + $0x108] sm:$0xff]  ;;  %v227_v51 = vld [vmem:[#allocation5 + $0x110] sm:$0xff] }
  0x32   :  { %470 = vmatprep.mubr.msk.f32.mxu0 %vm618_vm0, %v619_v1  ;;  %505 = vmatpush3.bf16.msra.mxu0 %v504_v36  ;;  %v519_v50 = vpack.c.bf16 %v226_v49, %v225_v48  ;;  %v228_v52 = vld [vmem:[#allocation5 + $0x118] sm:$0xff]  ;;  %v349_v54 = vld [vmem:[#allocation5 + $0x20] ss:$0 sm:$0xff]  ;;  %v230_v60 = vld [vmem:[#allocation5 + $0x128] sm:$0xff]  ;;  %vm326_vm2 = vcmp.ge.s32.totalorder %v307_v13, 16  ;;  %vm327_vm3 = vcmp.lt.s32.totalorder %v307_v13, 20 }
  0x33   :  { %487 = vmatpush3.bf16.msra.mxu1 %v486_v17  ;;  %506 = vmatprep.subr.bf16.mxu0 %v617_v0  ;;  %v522_v53 = vpack.c.bf16 %v228_v52, %v227_v51  ;;  %v229_v59 = vld [vmem:[#allocation5 + $0x120] sm:$0xff]  ;;  %v351_v62 = vld [vmem:[#allocation5 + $0xa8] ss:$0 sm:$0xff]  ;;  %v352_v4 = vld [vmem:[#allocation5 + $0x130] ss:$0 sm:$0xff]  ;;  %vm329_vm7 = vcmp.lt.s32.totalorder %v307_v13, 8 }
  0x34   :  { %488 = vmatprep.subr.bf16.mxu1 %v617_v0  ;;  %v525_v61 = vpack.c.bf16 %v230_v60, %v229_v59  ;;  %vm328_vm5 = vmand %vm326_vm2, %vm327_vm3 }
  0x36   :  { %508 = vmatpush3.bf16.msra.mxu0 %v507_v38 }
  0x37   :  { %490 = vmatpush3.bf16.msra.mxu1 %v489_v20  ;;  %509 = vmatprep.subr.bf16.mxu0 %v617_v0 }
  0x38   :  { %491 = vmatprep.subr.bf16.mxu1 %v617_v0 }
  0x3a   :  { %511 = vmatpush3.bf16.msra.mxu0 %v510_v41 }
  0x3b   :  { %493 = vmatpush3.bf16.msra.mxu1 %v492_v23  ;;  %512 = vmatprep.subr.bf16.mxu0 %v617_v0 }
  0x3c   :  { %494 = vmatprep.subr.bf16.mxu1 %v617_v0 }
  0x3e   :  { %514 = vmatpush3.bf16.msra.mxu0 %v513_v44 }
  0x3f   :  { %496 = vmatpush3.bf16.msra.mxu1 %v495_v26  ;;  %515 = vmatprep.subr.bf16.mxu0 %v617_v0 }
  0x40   :  { %497 = vmatprep.subr.bf16.mxu1 %v617_v0 }
  0x42   :  { %517 = vmatpush3.bf16.msra.mxu0 %v516_v47 }
  0x43   :  { %499 = vmatpush3.bf16.msra.mxu1 %v498_v29  ;;  %518 = vmatprep.subr.bf16.mxu0 %v617_v0 }
  0x44   :  { %500 = vmatprep.subr.bf16.mxu1 %v617_v0 }
  0x46   :  { %520 = vmatpush3.bf16.msra.mxu0 %v519_v50 }
  0x47   :  { %502 = vmatpush3.bf16.msra.mxu1 %v501_v32  ;;  %521 = vmatprep.subr.bf16.mxu0 %v617_v0 }
  0x4a   :  { %523 = vmatpush3.bf16.msra.mxu0 %v522_v53 }
  0x4b   :  { %524 = vmatprep.subr.bf16.mxu0 %v617_v0 }
  0x4e   :  { %526 = vmatpush3.bf16.msra.mxu0 %v525_v61 }
 0x104   :  { %v118_v55 = vpop.f32.mrb[0].mxu0 }
 0x105   :  { %v119_v56 = vadd.f32 %v349_v54, %v118_v55  ;;  %v402_v57 = vpop.f32.mrb[1].mxu0 }
 0x107   :  { %v122_v58 = vmax.f32 %v119_v56, 0.0 }
 0x109   :  { %436 = vmatmul.mubr.f32.vlgmr.msra.gmra.mrb[0].mxu1 %v122_v58 }
 0x1dc   :  { %v210_v63 = vpop.f32.mrb[0].mxu1 }
 0x1dd   :  { %v211_v1 = vadd.f32 %v351_v62, %v210_v63  ;;  %v437_v2 = vpop.f32.mrb[1].mxu1 }
 0x1df   :  { %v214_v3 = vmax.f32 %v211_v1, 0.0 }
 0x1e1   :  { %471 = vmatmul.mubr.f32.vlgmr.msra.gmra.mrb[2].mxu0 %v214_v3 }
 0x2b4   :  { %v302_v5 = vpop.f32.mrb[2].mxu0 }
 0x2b5   :  { %v303_v6 = vadd.f32 %v352_v4, %v302_v5  ;;  %v472_v0 = vpop.f32.mrb[3].mxu0 }
 0x2b7   :  { %v308_v7 = vmin.f32 %v303_v6, 20.0  ;;  %vm314_vm6 = vcmp.gt.f32.partialorder %v303_v6, 20.0  ;;  %v325_v20 = vmax.f32 %v303_v6, 0.0 }
 0x2b9   :  { %v309_v8 = vmul.f32 1.442695, %v308_v7 }
 0x2bb   :  { %535 = vpow2.f32 %v309_v8 }
 0x2c5   :  { %v536_v9 = vpop.eup %535 }
 0x2c6   :  { %v311_v10 = vadd.f32 1.0, %v536_v9  ;;  %v318_v12 = vmul.f32 -0.5, %v536_v9  ;;  %v321_v15 = vand.u32 2147483647, %v536_v9 }
 0x2c8   :  { %537 = vlog2.f32 %v311_v10  ;;  %v319_v14 = vadd.f32 1.0, %v318_v12  ;;  %vm322_vm4 = vcmp.lt.f32.partialorder %v321_v15, 0.0004427343 }
 0x2c9   :  { %539 = vrcp.f32 %v311_v10 }
 0x2ca   :  { %v320_v19 = vmul.f32 %v536_v9, %v319_v14 }
 0x2d2   :  { %v538_v16 = vpop.eup %537 }
 0x2d3   :  { %v540_v17 = vpop.eup %539  ;;  %v317_v18 = vmul.f32 0.6931472, %v538_v16 }
 0x2d4   :  { %v313_v22 = vmul.f32 %v540_v17, %v536_v9 }
 0x2d5   :  { %v323_v21 = vsel %vm322_vm4, %v320_v19, %v317_v18 }
 0x2d6   :  { %v324_v23 = vsel %vm314_vm6, %v303_v6, %v323_v21 }
 0x2d7   :  { %v330_v24 = vsel %vm328_vm5, %v325_v20, %v324_v23 }
 0x2d8   :  { %v331_v25 = vsel %vm329_vm7, %v313_v22, %v330_v24 }
 0x2d9   :  { %332 = vst [vmem:[#allocation7] sm:$0xff] %v331_v25 }
 0x2da   :  { %596 = shalt.err (!%p593_p6)
}
 0x2db   :  { %s597_s10 = scalar_lea.hbm %s702_s2, 128 }
 0x2dc   :  { %p598_p7 = scmp.ne.s32.totalorder %s702_s2, %s597_s10  ;;  %p601_p8 = scmp.lt.u32.totalorder %s597_s10, %s702_s2 }
 0x2de   :  { %p603_p9 = pnand %p601_p8, %p598_p7 }
 0x2e0   :  { %606 = shalt.err (!%p603_p9)
}
 0x2e1   :  { %342 = dma.vmem_to_hbm [thread:$0]  %s340_s6, 128, %s702_s2, [#allocation4]  }
 0x2e2   :  { %611 = dma.done.wait [#allocation4], 128  }
 0x2e3   :  { %612 = vsyncadd [#allocation4], 4294967168 }
 0x2e4   :  { %346 = vsyncpa [#allocation3], 1 }
 0x2e5   :  { %347 = vsyncpa [#allocation6], 1 }
 0x2e6   :  { %348 = vsyncpa [#allocation4], 1 }

</bundles_post_ra>
